<compile_context>
chip_gen: v5e
topology: v5e:2x2
jax: 0.10.0
libtpu: 0.0.40
codegen_flags: <defaults>
</compile_context>

<pallas_src>
import functools

import jax
import jax.numpy as jnp
from jax.experimental import pallas as pl
from jax.experimental.pallas import tpu as pltpu

NUM_ENVS = 2          # module-level `num_envs` (0 in the file would make
                      # value_heads empty and forward un-runnable; use 2)
IN_DIM = 4
HID = 128
HEAD_PAD = 128        # lane-dense output width; columns 0..4 carry the 5 heads
TB_MAX = 1024         # max batch tile; safe on v5e/v6e (128 MiB) and v7x (64 MiB)


# ----------------------------------------------------------------------------
# Kernel: whole forward pass for one batch tile, 2 matmuls total.
# ----------------------------------------------------------------------------
def policy_kernel(y_ref, w1_ref, b1_ref, w2_ref, b2_ref, out_ref):
    # Fused first layer: h[:, :128] = relu(affine1(y)); h[:, 128:] = relu(affine_pi0(y))
    h = jnp.maximum(
        jnp.dot(y_ref[...], w1_ref[...], preferred_element_type=jnp.float32)
        + b1_ref[...],
        0.0)

    # Fused heads: block-structured (256, 128) weight.
    #   rows   0..127 -> x-branch heads in columns 0..2 (mu, sigma2, value)
    #   rows 128..255 -> z-branch heads in columns 3..4 (mu_dist, sigma2_dist)
    o = jnp.dot(h, w2_ref[...], preferred_element_type=jnp.float32) + b2_ref[...]

    # softplus only on the sigma columns (1 and 4); lane-dense select.
    col = jax.lax.broadcasted_iota(jnp.int32, o.shape, 1)
    sp_mask = (col == 1) | (col == 4)
    out_ref[...] = jnp.where(sp_mask, jax.nn.softplus(o), o)


# ----------------------------------------------------------------------------
# Wrapper
# ----------------------------------------------------------------------------
@functools.partial(jax.jit, static_argnames=("env_idx",))
def policy_forward(y, params, env_idx):
    B = y.shape[0]

    # Tile sizing: single grid step for small batches, 1024-row tiles otherwise
    # (grid axis stays "parallel" so v7x's 2 TensorCores both get work).
    if B <= TB_MAX:
        B_pad = max(8, -(-B // 8) * 8)
        TB = B_pad
    else:
        B_pad = -(-B // TB_MAX) * TB_MAX
        TB = TB_MAX
    if B_pad != B:
        y = jnp.pad(y, ((0, B_pad - B), (0, 0)))

    # Head selection is static (env_idx is a Python int in the PyTorch module).
    mu_w, mu_b = params["mu_w"][env_idx], params["mu_b"][env_idx]
    sg_w, sg_b = params["sg_w"][env_idx], params["sg_b"][env_idx]
    v_w, v_b = params["v_w"][env_idx], params["v_b"][env_idx]
    mud_w, mud_b = params["mu_w"][NUM_ENVS], params["mu_b"][NUM_ENVS]
    sgd_w, sgd_b = params["sg_w"][NUM_ENVS], params["sg_b"][NUM_ENVS]

    # Pack first layer: (4, 256) weight, (1, 256) bias.
    w1 = jnp.concatenate([params["w1"], params["wpi0"]], axis=1)
    b1 = jnp.concatenate([params["b1"], params["bpi0"]], axis=1)

    # Pack heads into one (256, 128) block matrix + (1, 128) bias.
    w2 = jnp.zeros((2 * HID, HEAD_PAD), jnp.float32)
    w2 = w2.at[:HID, 0:3].set(jnp.concatenate([mu_w, sg_w, v_w], axis=1))
    w2 = w2.at[HID:, 3:5].set(jnp.concatenate([mud_w, sgd_w], axis=1))
    b2 = jnp.zeros((1, HEAD_PAD), jnp.float32)
    b2 = b2.at[:, 0:5].set(
        jnp.concatenate([mu_b, sg_b, v_b, mud_b, sgd_b], axis=1))

    rep = lambda shape: pl.BlockSpec(shape, lambda i: (0,) * len(shape))

    out = pl.pallas_call(
        policy_kernel,
        grid=(B_pad // TB,),
        in_specs=[
            pl.BlockSpec((TB, IN_DIM), lambda i: (i, 0)),   # y
            rep((IN_DIM, 2 * HID)), rep((1, 2 * HID)),      # fused first layer
            rep((2 * HID, HEAD_PAD)), rep((1, HEAD_PAD)),   # fused heads
        ],
        out_specs=pl.BlockSpec((TB, HEAD_PAD), lambda i: (i, 0)),
        out_shape=jax.ShapeDtypeStruct((B_pad, HEAD_PAD), jnp.float32),
        compiler_params=pltpu.CompilerParams(
            dimension_semantics=("parallel",)),
    )(y, w1, b1, w2, b2)

    out = out[:B]
    # Columns: 0=mu, 1=sigma, 2=value, 3=mu_dist, 4=sigma_dist
    return (out[:, 0:1], out[:, 1:2], out[:, 2:3], out[:, 3:4], out[:, 4:5])


# ----------------------------------------------------------------------------
# Deterministic parameter construction (mirrors the shapes in Policy.__init__)
# ----------------------------------------------------------------------------
def normalized_columns(key, shape, std):
    w = jax.random.normal(key, shape, jnp.float32)
    w = w * std / jnp.sqrt(jnp.sum(jnp.square(w), axis=0, keepdims=True))
    return w


def make_params(key):
    ks = jax.random.split(key, 16)
    fan_in = 1.0 / jnp.sqrt(IN_DIM)
    params = {
        # Linear(4, 128): stored as (in, out)
        "w1": jax.random.uniform(ks[0], (IN_DIM, HID), jnp.float32, -fan_in, fan_in),
        "b1": jax.random.uniform(ks[1], (1, HID), jnp.float32, -fan_in, fan_in),
        "wpi0": jax.random.uniform(ks[2], (IN_DIM, HID), jnp.float32, -fan_in, fan_in),
        "bpi0": jax.random.uniform(ks[3], (1, HID), jnp.float32, -fan_in, fan_in),
        # num_envs + 1 mu / sigma2 heads; num_envs value heads (stored stacked)
        "mu_w": jnp.stack([normalized_columns(ks[4 + i], (HID, 1), 0.01)
                           for i in range(NUM_ENVS + 1)]),
        "mu_b": jnp.zeros((NUM_ENVS + 1, 1, 1), jnp.float32),
        "sg_w": jnp.stack([jax.random.normal(ks[8 + i], (HID, 1), jnp.float32)
                           / jnp.sqrt(HID) for i in range(NUM_ENVS + 1)]),
        "sg_b": jnp.zeros((NUM_ENVS + 1, 1, 1), jnp.float32),
        "v_w": jnp.stack([normalized_columns(ks[12 + i], (HID, 1), 1.0)
                          for i in range(NUM_ENVS)]),
        "v_b": jnp.zeros((NUM_ENVS, 1, 1), jnp.float32),
    }
    return params


# Pure-JAX reference for verification (matches torch F.softplus semantics).
def policy_reference(y, params, env_idx):
    softplus = jax.nn.softplus
    x = jnp.maximum(y @ params["w1"] + params["b1"], 0.0)
    z = jnp.maximum(y @ params["wpi0"] + params["bpi0"], 0.0)
    mu = x @ params["mu_w"][env_idx] + params["mu_b"][env_idx]
    sigma = softplus(x @ params["sg_w"][env_idx] + params["sg_b"][env_idx])
    value = x @ params["v_w"][env_idx] + params["v_b"][env_idx]
    mu_d = z @ params["mu_w"][NUM_ENVS] + params["mu_b"][NUM_ENVS]
    sigma_d = softplus(z @ params["sg_w"][NUM_ENVS] + params["sg_b"][NUM_ENVS])
    return mu, sigma, value, mu_d, sigma_d


if __name__ == "__main__":
    key = jax.random.PRNGKey(0)
    pkey, ykey1, ykey2 = jax.random.split(key, 3)
    params = make_params(pkey)

    # Small batch (single grid step), plus a non-multiple-of-8 batch to
    # exercise the padding path.
    for B, ykey, env_idx in ((8, ykey1, 0), (12, ykey2, 1)):
        y = jax.random.normal(ykey, (B, IN_DIM), jnp.float32)
        outs = policy_forward(y, params, env_idx)
        outs = jax.block_until_ready(outs)
        refs = policy_reference(y, params, env_idx)
        for o, r in zip(outs, refs):
            assert o.shape == (B, 1), o.shape
            assert jnp.allclose(o, r, atol=1e-5, rtol=1e-5), (o, r)

    print("KERNEL_OK")
</pallas_src>

<mosaic_0001>
module attributes {stable_mosaic.version = 11 : i64} {
  func.func @policy_kernel(%arg0: i32, %arg1: memref<8x4xf32, #tpu.memory_space<vmem>>, %arg2: memref<4x256xf32, #tpu.memory_space<vmem>>, %arg3: memref<1x256xf32, #tpu.memory_space<vmem>>, %arg4: memref<256x128xf32, #tpu.memory_space<vmem>>, %arg5: memref<1x128xf32, #tpu.memory_space<vmem>>, %arg6: memref<8x128xf32, #tpu.memory_space<vmem>>) attributes {dimension_semantics = [#tpu.dimension_semantics<parallel>], iteration_bounds = array<i64: 1>, scalar_prefetch = 0 : i64, scratch_operands = 0 : i64, tpu.core_type = #tpu.core_type<tc>, window_params = [{transform_indices = @transform_0, window_bounds = array<i64: 8, 4>}, {pipeline_mode = #tpu.pipeline_mode<synchronous>, transform_indices = @transform_1, window_bounds = array<i64: 4, 256>}, {pipeline_mode = #tpu.pipeline_mode<synchronous>, transform_indices = @transform_2, window_bounds = array<i64: 1, 256>}, {pipeline_mode = #tpu.pipeline_mode<synchronous>, transform_indices = @transform_3, window_bounds = array<i64: 256, 128>}, {pipeline_mode = #tpu.pipeline_mode<synchronous>, transform_indices = @transform_4, window_bounds = array<i64: 1, 128>}, {transform_indices = @transform_5, window_bounds = array<i64: 8, 128>}]} {
    %c0 = arith.constant 0 : index
    %c0_0 = arith.constant 0 : index
    %0 = vector.load %arg1[%c0, %c0_0] : memref<8x4xf32, #tpu.memory_space<vmem>>, vector<8x4xf32>
    %c0_1 = arith.constant 0 : index
    %c0_2 = arith.constant 0 : index
    %1 = vector.load %arg2[%c0_1, %c0_2] : memref<4x256xf32, #tpu.memory_space<vmem>>, vector<4x256xf32>
    %cst = arith.constant dense<0.000000e+00> : vector<8x256xf32>
    %2 = tpu.matmul %0, %1, %cst {dimension_numbers = #tpu.dot_dimension_numbers<[1], [0], [0], [1], [0, 0, 1, 1], [], []>} : vector<8x4xf32>, vector<4x256xf32>, vector<8x256xf32> -> vector<8x256xf32>
    %c0_3 = arith.constant 0 : index
    %c0_4 = arith.constant 0 : index
    %3 = vector.load %arg3[%c0_3, %c0_4] : memref<1x256xf32, #tpu.memory_space<vmem>>, vector<1x256xf32>
    %4 = vector.broadcast %3 : vector<1x256xf32> to vector<8x256xf32>
    %5 = arith.addf %2, %4 : vector<8x256xf32>
    %cst_5 = arith.constant 0.000000e+00 : f32
    %6 = vector.broadcast %cst_5 : f32 to vector<8x256xf32>
    %7 = arith.maximumf %5, %6 : vector<8x256xf32>
    %c0_6 = arith.constant 0 : index
    %c0_7 = arith.constant 0 : index
    %8 = vector.load %arg4[%c0_6, %c0_7] : memref<256x128xf32, #tpu.memory_space<vmem>>, vector<256x128xf32>
    %cst_8 = arith.constant dense<0.000000e+00> : vector<8x128xf32>
    %9 = tpu.matmul %7, %8, %cst_8 {dimension_numbers = #tpu.dot_dimension_numbers<[1], [0], [0], [1], [0, 0, 1, 1], [], []>} : vector<8x256xf32>, vector<256x128xf32>, vector<8x128xf32> -> vector<8x128xf32>
    %c0_9 = arith.constant 0 : index
    %c0_10 = arith.constant 0 : index
    %10 = vector.load %arg5[%c0_9, %c0_10] : memref<1x128xf32, #tpu.memory_space<vmem>>, vector<1x128xf32>
    %11 = vector.broadcast %10 : vector<1x128xf32> to vector<8x128xf32>
    %12 = arith.addf %9, %11 : vector<8x128xf32>
    %13 = tpu.iota {dimensions = array<i32: 1>} : vector<8x128xi32>
    %c1_i32 = arith.constant 1 : i32
    %14 = vector.broadcast %c1_i32 : i32 to vector<8x128xi32>
    %15 = arith.cmpi eq, %13, %14 : vector<8x128xi32>
    %c4_i32 = arith.constant 4 : i32
    %16 = vector.broadcast %c4_i32 : i32 to vector<8x128xi32>
    %17 = arith.cmpi eq, %13, %16 : vector<8x128xi32>
    %18 = arith.ori %15, %17 : vector<8x128xi1>
    %cst_11 = arith.constant 0.000000e+00 : f32
    %19 = vector.broadcast %cst_11 : f32 to vector<8x128xf32>
    %20 = arith.maximumf %12, %19 : vector<8x128xf32>
    %21 = vector.broadcast %cst_11 : f32 to vector<8x128xf32>
    %22 = arith.subf %12, %21 : vector<8x128xf32>
    %23 = arith.cmpf one, %22, %22 : vector<8x128xf32>
    %24 = vector.broadcast %cst_11 : f32 to vector<8x128xf32>
    %25 = arith.addf %12, %24 : vector<8x128xf32>
    %26 = math.absf %22 : vector<8x128xf32>
    %cst_12 = arith.constant 0.000000e+00 : f32
    %27 = vector.broadcast %cst_12 : f32 to vector<8x128xf32>
    %28 = arith.subf %27, %26 : vector<8x128xf32>
    %29 = math.exp %28 : vector<8x128xf32>
    %30 = math.log1p %29 : vector<8x128xf32>
    %31 = arith.addf %20, %30 : vector<8x128xf32>
    %32 = arith.select %23, %25, %31 : vector<8x128xi1>, vector<8x128xf32>
    %33 = arith.select %18, %32, %12 : vector<8x128xi1>, vector<8x128xf32>
    %c0_13 = arith.constant 0 : index
    %c0_14 = arith.constant 0 : index
    %34 = vector.load %arg6[%c0_13, %c0_14] : memref<8x128xf32, #tpu.memory_space<vmem>>, vector<8x128xf32>
    tpu.vector_store %arg6[%c0_13, %c0_14], %33 {strides = array<i32>} : memref<8x128xf32, #tpu.memory_space<vmem>>, vector<8x128xf32>,
    return
  }
  func.func @transform_0(%arg0: i32) -> (i32, i32) {
    %c0_i32 = arith.constant 0 : i32
    %c0_i32_0 = arith.constant 0 : i32
    return %arg0, %c0_i32 : i32, i32
  }
  func.func @transform_1(%arg0: i32) -> (i32, i32) {
    %c0_i32 = arith.constant 0 : i32
    %c0_i32_0 = arith.constant 0 : i32
    %c0_i32_1 = arith.constant 0 : i32
    return %c0_i32, %c0_i32_0 : i32, i32
  }
  func.func @transform_2(%arg0: i32) -> (i32, i32) {
    %c0_i32 = arith.constant 0 : i32
    %c0_i32_0 = arith.constant 0 : i32
    %c0_i32_1 = arith.constant 0 : i32
    return %c0_i32, %c0_i32_0 : i32, i32
  }
  func.func @transform_3(%arg0: i32) -> (i32, i32) {
    %c0_i32 = arith.constant 0 : i32
    %c0_i32_0 = arith.constant 0 : i32
    %c0_i32_1 = arith.constant 0 : i32
    return %c0_i32, %c0_i32_0 : i32, i32
  }
  func.func @transform_4(%arg0: i32) -> (i32, i32) {
    %c0_i32 = arith.constant 0 : i32
    %c0_i32_0 = arith.constant 0 : i32
    %c0_i32_1 = arith.constant 0 : i32
    return %c0_i32, %c0_i32_0 : i32, i32
  }
  func.func @transform_5(%arg0: i32) -> (i32, i32) {
    %c0_i32 = arith.constant 0 : i32
    %c0_i32_0 = arith.constant 0 : i32
    return %arg0, %c0_i32 : i32, i32
  }
}

</mosaic_0001>

<bundles_post_ra>
// kernel: policy_forward.1
= control target key start
LH: loop header
LB: loop body
LE: loop exit
PB: predicated region body
PF: predicated region fallthrough
CT: control target
= control target key end

     0   :  { %vm36_vm0 = vcmask 1043456   ;;  %vm32_vm1 = vcmask 31744   ;;  %v159_v55 = vlaneseq  ;;  %s338_s1 = inlined_call_operand.vmem [shape: f32[4,256], index: 1, kind: input, shape index: {}]   ;;  %s339_s3 = inlined_call_operand.vmem [shape: f32[256,128], index: 3, kind: input, shape index: {}]   ;;  %s340_s0 = inlined_call_operand.vmem [shape: f32[8,4], index: 0, kind: input, shape index: {}]   ;;  %s341_s4 = inlined_call_operand.vmem [shape: f32[1,128], index: 4, kind: input, shape index: {}]   ;;  %s342_s2 = inlined_call_operand.vmem [shape: f32[1,256], index: 2, kind: input, shape index: {}]   ;;  %s343_s5 = inlined_call_operand.vmem [shape: f32[8,128], index: 5, kind: output, shape index: {}]  }
   0x1   :  { %v21_v0 = vld [vmem:[%s338_s1] sm:$0xff]  ;;  %v98_v1 = vld [vmem:[%s339_s3 + $0x78] sm:$0xff]  ;;  %v97_v2 = vld [vmem:[%s339_s3 + $0x70] sm:$0xff] }
   0x2   :  { %29 = vst [vmem:[#allocation1] ss:$2 sm:$0xff] %v21_v0  ;;  %119 = vmatpush.msra.mxu2 %v98_v1  ;;  %v114_v3 = vld [vmem:[%s339_s3 + $0xf8] sm:$0xff]  ;;  %v96_v4 = vld [vmem:[%s339_s3 + $0x68] sm:$0xff]  ;;  %v113_v5 = vld [vmem:[%s339_s3 + $0xf0] sm:$0xff]  ;;  %v160_v57 = vand.u32 127, %v159_v55 }
   0x3   :  { %139 = vmatpush.msra.mxu3 %v114_v3  ;;  %v112_v6 = vld [vmem:[%s339_s3 + $0xe8] sm:$0xff]  ;;  %v95_v7 = vld [vmem:[%s339_s3 + $0x60] sm:$0xff]  ;;  %v94_v10 = vld [vmem:[%s339_s3 + $0x58] sm:$0xff] }
   0x4   :  { %120 = vmatpush.msra.mxu2 %v97_v2  ;;  %v111_v8 = vld [vmem:[%s339_s3 + $0xe0] sm:$0xff]  ;;  %v110_v11 = vld [vmem:[%s339_s3 + $0xd8] sm:$0xff]  ;;  %v93_v14 = vld [vmem:[%s339_s3 + $0x50] sm:$0xff]  ;;  %vm161_vm2 = vcmp.eq.s32.totalorder %v160_v57, 1  ;;  %vm162_vm3 = vcmp.eq.s32.totalorder %v160_v57, 4 }
   0x5   :  { %140 = vmatpush.msra.mxu3 %v113_v5  ;;  %v20_v9 = vld [vmem:[%s340_s0] sm:$0xff]  ;;  %v109_v15 = vld [vmem:[%s339_s3 + $0xd0] sm:$0xff]  ;;  %v92_v16 = vld [vmem:[%s339_s3 + $0x48] sm:$0xff] }
   0x6   :  { %121 = vmatpush.msra.mxu2 %v96_v4  ;;  %v108_v17 = vld [vmem:[%s339_s3 + $0xc8] sm:$0xff]  ;;  %v91_v18 = vld [vmem:[%s339_s3 + $0x40] sm:$0xff]  ;;  %v90_v20 = vld [vmem:[%s339_s3 + $0x38] sm:$0xff] }
   0x7   :  { %141 = vmatpush.msra.mxu3 %v112_v6  ;;  %v107_v19 = vld [vmem:[%s339_s3 + $0xc0] sm:$0xff]  ;;  %v106_v21 = vld [vmem:[%s339_s3 + $0xb8] sm:$0xff]  ;;  %v89_v22 = vld [vmem:[%s339_s3 + $0x30] sm:$0xff] }
   0x8   :  { %122 = vmatpush.msra.mxu2 %v95_v7  ;;  %v105_v23 = vld [vmem:[%s339_s3 + $0xb0] sm:$0xff]  ;;  %v88_v24 = vld [vmem:[%s339_s3 + $0x28] sm:$0xff]  ;;  %v87_v26 = vld [vmem:[%s339_s3 + $0x20] sm:$0xff] }
   0x9   :  { %v30_v12 = vld.sshfl [vmem:[#allocation1] sm:$0xff pattern:$0x75316420]  ;;  %v31_v13 = vld.sshfl [vmem:[#allocation1 + $0x8] sm:$0xff pattern:$0x75316420]  ;;  %142 = vmatpush.msra.mxu3 %v111_v8  ;;  %vm163_vm5 = vmor %vm161_vm2, %vm162_vm3 }
   0xa   :  { %188 = vmatpush.msk.msra.mxu0 %vm36_vm0, %v30_v12  ;;  %190 = vmatpush.msk.msra.mxu1 %vm36_vm0, %v31_v13  ;;  %v104_v25 = vld [vmem:[%s339_s3 + $0xa8] sm:$0xff]  ;;  %v103_v27 = vld [vmem:[%s339_s3 + $0xa0] sm:$0xff]  ;;  %v86_v28 = vld [vmem:[%s339_s3 + $0x18] sm:$0xff] }
   0xb   :  { %189 = vmatmul.msk.f32.vlgmr.msra.gmra.mxu0 %vm32_vm1, %v20_v9  ;;  %191 = vmatmul.msk.f32.vlgmr.msra.gmra.mxu1 %vm32_vm1, %v20_v9  ;;  %v85_v29 = vld [vmem:[%s339_s3 + $0x10] sm:$0xff]  ;;  %v102_v30 = vld [vmem:[%s339_s3 + $0x98] sm:$0xff]  ;;  %v84_v31 = vld [vmem:[%s339_s3 + $0x8] sm:$0xff] }
   0xc   :  { %123 = vmatpush.msra.mxu2 %v94_v10  ;;  %143 = vmatpush.msra.mxu3 %v110_v11  ;;  %v101_v32 = vld [vmem:[%s339_s3 + $0x90] sm:$0xff]  ;;  %v83_v33 = vld [vmem:[%s339_s3] sm:$0xff]  ;;  %v100_v34 = vld [vmem:[%s339_s3 + $0x88] sm:$0xff] }
   0xd   :  { %v99_v35 = vld [vmem:[%s339_s3 + $0x80] sm:$0xff] }
   0xe   :  { %124 = vmatpush.msra.mxu2 %v93_v14  ;;  %144 = vmatpush.msra.mxu3 %v109_v15  ;;  %v22_v36 = vld [vmem:[%s342_s2] sm:$0x3] }
   0xf   :  { %v24_v37 = vperm.slane %v22_v36, 0  ;;  %v25_v38 = vperm.slane %v22_v36, 1  ;;  %v192_v45 = vld [vmem:[%s341_s4] ss:$0 sm:$0xff] }
  0x10   :  { %125 = vmatpush.msra.mxu2 %v92_v16  ;;  %145 = vmatpush.msra.mxu3 %v108_v17 }
  0x12   :  { %126 = vmatpush.msra.mxu2 %v91_v18  ;;  %146 = vmatpush.msra.mxu3 %v107_v19 }
  0x14   :  { %127 = vmatpush.msra.mxu2 %v90_v20  ;;  %147 = vmatpush.msra.mxu3 %v106_v21 }
  0x16   :  { %128 = vmatpush.msra.mxu2 %v89_v22  ;;  %148 = vmatpush.msra.mxu3 %v105_v23 }
  0x18   :  { %129 = vmatpush.msra.mxu2 %v88_v24  ;;  %149 = vmatpush.msra.mxu3 %v104_v25 }
  0x1a   :  { %130 = vmatpush.msra.mxu2 %v87_v26  ;;  %150 = vmatpush.msra.mxu3 %v103_v27 }
  0x1c   :  { %131 = vmatpush.msra.mxu2 %v86_v28  ;;  %151 = vmatpush.msra.mxu3 %v102_v30 }
  0x1e   :  { %132 = vmatpush.msra.mxu2 %v85_v29  ;;  %152 = vmatpush.msra.mxu3 %v101_v32 }
  0x20   :  { %133 = vmatpush.msra.mxu2 %v84_v31  ;;  %153 = vmatpush.msra.mxu3 %v100_v34 }
  0x22   :  { %134 = vmatpush.msra.mxu2 %v83_v33  ;;  %154 = vmatpush.msra.mxu3 %v99_v35 }
  0x88   :  { %v58_v39 = vpop.f32.mrf.mxu0  ;;  %v78_v40 = vpop.f32.mrf.mxu1 }
  0x89   :  { %v59_v41 = vadd.f32 %v58_v39, %v24_v37  ;;  %v79_v42 = vadd.f32 %v78_v40, %v25_v38 }
  0x8b   :  { %v81_v43 = vmax.f32 %v59_v41, 0.0  ;;  %v82_v44 = vmax.f32 %v79_v42, 0.0 }
  0x8d   :  { %135 = vmatmul.f32.vlgmr.msra.gmra.mxu2 %v81_v43  ;;  %155 = vmatmul.f32.vlgmr.msra.gmra.mxu3 %v82_v44 }
 0x110   :  { %v136_v46 = vpop.f32.mrf.mxu2  ;;  %v156_v47 = vpop.f32.mrf.mxu3 }
 0x111   :  { %v137_v48 = vadd.f32 %v192_v45, %v136_v46 }
 0x113   :  { %v157_v49 = vadd.f32 %v156_v47, %v137_v48 }
 0x115   :  { %v167_v50 = vand.u32 2147483647, %v157_v49  ;;  %v164_v63 = vmax.f32 %v157_v49, 0.0  ;;  %vm165_vm6 = vcmp.ne.f32.partialorder %v157_v49, %v157_v49 }
 0x117   :  { %v168_v51 = vsub.f32 0.0, %v167_v50 }
 0x119   :  { %v169_v52 = vmul.f32 1.442695, %v168_v51 }
 0x11b   :  { %193 = vpow2.f32 %v169_v52 }
 0x121   :  { %v194_v53 = vpop.eup %193 }
 0x122   :  { %v171_v54 = vadd.f32 1.0, %v194_v53  ;;  %v174_v56 = vmul.f32 -0.5, %v194_v53  ;;  %v177_v59 = vand.u32 2147483647, %v194_v53 }
 0x124   :  { %195 = vlog2.f32 %v171_v54  ;;  %v175_v58 = vadd.f32 1.0, %v174_v56  ;;  %vm178_vm4 = vcmp.lt.f32.partialorder %v177_v59, 0.0004427343 }
 0x126   :  { %v176_v62 = vmul.f32 %v194_v53, %v175_v58 }
 0x12a   :  { %v196_v60 = vpop.eup %195 }
 0x12b   :  { %v173_v61 = vmul.f32 0.6931472, %v196_v60 }
 0x12d   :  { %v179_v0 = vsel %vm178_vm4, %v176_v62, %v173_v61 }
 0x12e   :  { %v180_v1 = vadd.f32 %v179_v0, %v164_v63 }
 0x130   :  { %v181_v2 = vsel %vm165_vm6, %v157_v49, %v180_v1 }
 0x131   :  { %v182_v3 = vsel %vm163_vm5, %v181_v2, %v157_v49 }
 0x132   :  { %183 = vst [vmem:[%s343_s5] sm:$0xff] %v182_v3 }

</bundles_post_ra>
